<compile_context>
chip_gen: v5e
topology: v5e:2x2
jax: 0.10.0
libtpu: 0.0.40
codegen_flags: <defaults>
</compile_context>

<pallas_src>
import jax
import jax.numpy as jnp
from jax.experimental import pallas as pl
from jax.experimental.pallas import tpu as pltpu


_LANE = 128
_TINY_BYTES = 1 << 20          # below this: single whole-array block, no tiling
_TARGET_BLOCK_BYTES = 1 << 20  # ~1 MiB tiles when tiling (near HBM roofline,
                               # safe for every generation's VMEM budget)


# ----------------------------- kernels ------------------------------------


def _copy1_kernel(x_ref, o_ref):
    # forward() with conditional_generation=True: return x
    o_ref[...] = x_ref[...]


def _copy2_kernel(x_ref, y_ref, ox_ref, oy_ref):
    # forward() with conditional_generation=False: return (x, y), fused into
    # one launch (pure launch/DMA latency at these sizes).
    ox_ref[...] = x_ref[...]
    oy_ref[...] = y_ref[...]


# --------------------------- copy strategies --------------------------------


def _whole_copy(x, *, alias=False):
    """Single grid-free launch, whole array as one VMEM block."""
    kwargs = {"input_output_aliases": {0: 0}} if alias else {}
    return pl.pallas_call(
        _copy1_kernel,
        out_shape=jax.ShapeDtypeStruct(x.shape, x.dtype),
        **kwargs,
    )(x)


def _whole_copy_pair(x, y, *, alias=False):
    """Single fused grid-free launch emitting both outputs."""
    kwargs = {"input_output_aliases": {0: 0, 1: 1}} if alias else {}
    return pl.pallas_call(
        _copy2_kernel,
        out_shape=(jax.ShapeDtypeStruct(x.shape, x.dtype),
                   jax.ShapeDtypeStruct(y.shape, y.dtype)),
        **kwargs,
    )(x, y)


def _lane_dense_width(n):
    """Pick a lane-dense last dim (multiple of 128) that divides n, or None."""
    if n % 512 == 0:
        return 512
    if n % _LANE == 0:
        return _LANE
    return None


def _tiled_copy(a, *, alias=False):
    """Lane-dense, ~1 MiB-block pipelined copy for large parameter arrays."""
    n = a.size
    width = _lane_dense_width(n)
    if width is None:
        # Can't make it lane-dense; fall back to a single whole-array block.
        return _whole_copy(a, alias=alias)

    rows = n // width
    flat = a.reshape(rows, width)                 # lane-dense 2-D slab
    row_bytes = width * flat.dtype.itemsize
    tm = max(8, (_TARGET_BLOCK_BYTES // row_bytes) // 8 * 8)
    tm = min(tm, rows)                            # full dim if array is small
    grid = (pl.cdiv(rows, tm),)

    kwargs = {"input_output_aliases": {0: 0}} if alias else {}
    out = pl.pallas_call(
        _copy1_kernel,
        grid=grid,
        in_specs=[pl.BlockSpec((tm, width), lambda i: (i, 0))],
        out_specs=pl.BlockSpec((tm, width), lambda i: (i, 0)),
        out_shape=jax.ShapeDtypeStruct(flat.shape, flat.dtype),
        compiler_params=pltpu.CompilerParams(
            dimension_semantics=("parallel",)),   # lever only on v7x (2 TCs)
        **kwargs,
    )(flat)
    return out.reshape(a.shape)


def _copy(a, *, alias=False):
    if a.nbytes <= _TINY_BYTES:
        return _whole_copy(a, alias=alias)
    return _tiled_copy(a, alias=alias)


# ----------------------------- forward --------------------------------------


def distiller_forward(params, *, conditional_generation=True,
                      use_pallas=True, alias_outputs=False):
    """Pallas equivalent of Distiller.forward().

    conditional_generation=True  -> returns x
    conditional_generation=False -> returns (x, y)

    use_pallas=False is the recommended production path: forward() is a pure
    parameter read-out, so returning the params directly avoids the HBM round
    trip and launch latency entirely.
    alias_outputs=True makes the kernel outputs alias the parameter buffers
    (halves HBM write traffic; callers must not rely on distinct buffers).
    """
    x = params["x"]

    if conditional_generation:
        if not use_pallas:
            return x
        return _copy(x, alias=alias_outputs)

    y = params["y"]
    if not use_pallas:
        return x, y
    if x.nbytes <= _TINY_BYTES and y.nbytes <= _TINY_BYTES:
        # One fused launch for both tiny read-outs.
        return _whole_copy_pair(x, y, alias=alias_outputs)
    # Large params: each gets its own lane-dense near-roofline copy.
    return (_copy(x, alias=alias_outputs), _copy(y, alias=alias_outputs))


# -------------------------- parameter init ----------------------------------


def init_params(key, batch_size, state_size, action_size,
                inner_lr=0.02, inner_momentum=0.5,
                conditional_generation=True):
    """Mirrors Distiller.__init__: x ~ N(0,1), optional y ~ N(0,1), scalars."""
    kx, ky = jax.random.split(key)
    params = {
        "x": jax.random.normal(kx, (batch_size, state_size), jnp.float32),
        # Trainable scalars in the module; unused by forward(). Kept for parity.
        "inner_lr": jnp.float32(inner_lr),
        "inner_momentum": jnp.float32(inner_momentum),
    }
    if not conditional_generation:
        params["y"] = jax.random.normal(
            ky, (batch_size, action_size), jnp.float32)
    return params


# ------------------------------- main ---------------------------------------

if __name__ == "__main__":
    key = jax.random.PRNGKey(0)
    k1, k2, k3 = jax.random.split(key, 3)

    batch_size, state_size, action_size = 8, 4, 2

    # --- conditional path (module default): forward() -> x, tiny fused copy ---
    p_cond = init_params(k1, batch_size, state_size, action_size,
                         conditional_generation=True)
    x_out = distiller_forward(p_cond, conditional_generation=True)
    jax.block_until_ready(x_out)
    assert x_out.shape == (batch_size, state_size)
    assert jnp.array_equal(x_out, p_cond["x"])

    # --- unconditional path: forward() -> (x, y), one fused launch ---
    p_unc = init_params(k2, batch_size, state_size, action_size,
                        conditional_generation=False)
    x2, y2 = distiller_forward(p_unc, conditional_generation=False)
    jax.block_until_ready((x2, y2))
    assert x2.shape == (batch_size, state_size)
    assert y2.shape == (batch_size, action_size)
    assert jnp.array_equal(x2, p_unc["x"])
    assert jnp.array_equal(y2, p_unc["y"])

    # --- larger batch exercises the lane-dense tiled path (grid > 1) ---
    big_batch = 131072  # 131072 x 4 f32 = 2 MiB -> (1024, 512) slab, 512-row tiles
    p_big = init_params(k3, big_batch, state_size, action_size,
                        conditional_generation=True)
    xb = distiller_forward(p_big, conditional_generation=True)
    jax.block_until_ready(xb)
    assert xb.shape == (big_batch, state_size)
    assert jnp.array_equal(xb, p_big["x"])

    # --- recommended production path: no kernel at all (pure read-out) ---
    x_fast = distiller_forward(p_cond, conditional_generation=True,
                               use_pallas=False)
    assert x_fast is p_cond["x"]

    print("KERNEL_OK")
</pallas_src>

<mosaic_0001>
module attributes {stable_mosaic.version = 11 : i64} {
  func.func @_copy1_kernel(%arg0: memref<8x4xf32, #tpu.memory_space<vmem>>, %arg1: memref<8x4xf32, #tpu.memory_space<vmem>>) attributes {dimension_semantics = [], scalar_prefetch = 0 : i64, scratch_operands = 0 : i64, tpu.core_type = #tpu.core_type<tc>} {
    %c0 = arith.constant 0 : index
    %c0_0 = arith.constant 0 : index
    %0 = vector.load %arg0[%c0, %c0_0] : memref<8x4xf32, #tpu.memory_space<vmem>>, vector<8x4xf32>
    %c0_1 = arith.constant 0 : index
    %c0_2 = arith.constant 0 : index
    %1 = vector.load %arg1[%c0_1, %c0_2] : memref<8x4xf32, #tpu.memory_space<vmem>>, vector<8x4xf32>
    tpu.vector_store %arg1[%c0_1, %c0_2], %0 {strides = array<i32>} : memref<8x4xf32, #tpu.memory_space<vmem>>, vector<8x4xf32>,
    return
  }
}

</mosaic_0001>

<bundles_post_ra>
// kernel: tpu_custom_call.1
= control target key start
LH: loop header
LB: loop body
LE: loop exit
PB: predicated region body
PF: predicated region fallthrough
CT: control target
= control target key end

     0   :  { %vm9_vm0 = vcmask 31744   ;;  %s31_s0 = inlined_call_operand.vmem [shape: f32[8,4], index: 0, kind: input, shape index: {}]   ;;  %s32_s1 = inlined_call_operand.vmem [shape: f32[8,4], index: 1, kind: output, shape index: {}]  }
   0x1   :  { %v8_v0 = vld [vmem:[%s31_s0] sm:$0xff] }
   0x2   :  { %10 = vst.msk [vmem:[%s32_s1] sm:$0xff] %vm9_vm0, %v8_v0 }

</bundles_post_ra>
